<compile_context>
chip_gen: v7x
topology: tpu7x:2x2x1
jax: 0.10.0
libtpu: 0.0.40
codegen_flags: <defaults>
</compile_context>

<pallas_src>
import math

import jax
import jax.numpy as jnp
from jax.experimental import pallas as pl
from jax.experimental.pallas import tpu as pltpu


def _gfp_kernel_rowmajor(x_ref, w_ref, out_ref):
    # x_ref:   (TB, 1)          f32  (batch on sublanes)
    # w_ref:   (1, half)        f32  (features on lanes), resident every step
    # out_ref: (TB, 2*half)     f32  sin -> lanes [0:half), cos -> lanes [half:2*half)
    half = w_ref.shape[1]
    # Exact reference op order: (x * W) * 2 * pi  (bit-identical angles).
    # The two extra full-tile multiplies are free filler under the sin/cos bottleneck.
    x_proj = x_ref[...] * w_ref[...] * 2.0 * math.pi            # (TB, half)
    # half % 128 == 0 on this path -> both stores are lane-aligned, unmasked.
    out_ref[:, :half] = jnp.sin(x_proj)
    out_ref[:, half:] = jnp.cos(x_proj)


def _gfp_kernel_transposed(x_ref, w_ref, out_ref):
    # x_ref:   (1, TB)          f32  (batch on lanes)
    # w_ref:   (half, 1)        f32  (features on sublanes), resident every step
    # out_ref: (2*half, TB)     f32  sin -> rows [0:half), cos -> rows [half:2*half)
    half = w_ref.shape[0]
    # W*x == x*W exactly (IEEE multiply commutes), then *2*pi in reference order.
    x_proj = w_ref[...] * x_ref[...] * 2.0 * math.pi            # (half, TB)
    # Full-lane-width stores.  If half % 8 != 0 the second store starts at a
    # non-8-aligned sublane (slightly slower, still correct).
    out_ref[:half, :] = jnp.sin(x_proj)
    out_ref[half:, :] = jnp.cos(x_proj)


def gaussian_fourier_projection(x, W, *, max_tile=1024):
    """x: (B,) float32, W: (half,) float32 -> (B, 2*half) float32."""
    B = x.shape[0]
    half = W.shape[0]
    embed_dim = 2 * half

    x = x.astype(jnp.float32)
    W = W.astype(jnp.float32)

    # ---- batch tile selection (always a multiple of 128 lanes) ----
    n_lane_tiles = pl.cdiv(B, 128)                 # 128-wide lane tiles needed
    min_steps = 2 if n_lane_tiles >= 2 else 1      # feed v7x's 2nd TC when possible
    tiles_per_block = min(max_tile // 128, pl.cdiv(n_lane_tiles, min_steps))
    # Keep the double-buffered output block under ~16 MiB (v7x scoped-VMEM safe).
    vmem_cap_tiles = max(1, (16 * 1024 * 1024) // (2 * 4 * embed_dim * 128))
    tiles_per_block = max(1, min(tiles_per_block, vmem_cap_tiles))
    TB = 128 * tiles_per_block
    n_blocks = pl.cdiv(B, TB)
    B_pad = n_blocks * TB

    compiler_params = pltpu.CompilerParams(dimension_semantics=("parallel",))

    if half % 128 == 0:
        # -------- Direct (B, embed_dim) layout: no wrapper transpose. --------
        x_col = x.reshape(B, 1)
        if B_pad != B:
            x_col = jnp.pad(x_col, ((0, B_pad - B), (0, 0)))
        w_row = W.reshape(1, half)
        out = pl.pallas_call(
            _gfp_kernel_rowmajor,
            out_shape=jax.ShapeDtypeStruct((B_pad, embed_dim), jnp.float32),
            grid=(n_blocks,),
            in_specs=[
                pl.BlockSpec((TB, 1), lambda i: (i, 0)),      # x tile over batch
                pl.BlockSpec((1, half), lambda i: (0, 0)),    # W resident
            ],
            out_specs=pl.BlockSpec((TB, embed_dim), lambda i: (i, 0)),
            compiler_params=compiler_params,
        )(x_col, w_row)
        return out[:B, :] if B_pad != B else out

    # -------- Fallback: transposed lane-dense layout (small / odd half). --------
    x_row = x.reshape(1, B)
    if B_pad != B:
        x_row = jnp.pad(x_row, ((0, 0), (0, B_pad - B)))
    w_col = W.reshape(half, 1)
    out_t = pl.pallas_call(
        _gfp_kernel_transposed,
        out_shape=jax.ShapeDtypeStruct((embed_dim, B_pad), jnp.float32),
        grid=(n_blocks,),
        in_specs=[
            pl.BlockSpec((1, TB), lambda i: (0, i)),          # x tile over batch lanes
            pl.BlockSpec((half, 1), lambda i: (0, 0)),        # W resident
        ],
        out_specs=pl.BlockSpec((embed_dim, TB), lambda i: (0, i)),
        compiler_params=compiler_params,
    )(x_row, w_col)
    # Layout plumbing back to (B, embed_dim) -- only for the non-128-multiple path.
    return out_t[:, :B].T


def _reference(x, W):
    x_proj = x[:, None] * W[None, :] * 2 * math.pi
    return jnp.concatenate([jnp.sin(x_proj), jnp.cos(x_proj)], axis=-1)


if __name__ == "__main__":
    key = jax.random.PRNGKey(0)
    k_w1, k_x1, k_w2, k_x2 = jax.random.split(key, 4)
    scale = 30.0

    # Case 1: small embed_dim (fallback transposed path).
    embed_dim1, B1 = 32, 8
    W1 = jax.random.normal(k_w1, (embed_dim1 // 2,), dtype=jnp.float32) * scale
    x1 = jax.random.uniform(k_x1, (B1,), dtype=jnp.float32)
    out1 = jax.block_until_ready(gaussian_fourier_projection(x1, W1))
    ref1 = _reference(x1, W1)
    assert out1.shape == (B1, embed_dim1)
    assert jnp.allclose(out1, ref1, atol=1e-4), "mismatch vs reference (small)"

    # Case 2: 128-multiple half (direct row-major path, 2 grid steps, padded batch).
    embed_dim2, B2 = 256, 200
    W2 = jax.random.normal(k_w2, (embed_dim2 // 2,), dtype=jnp.float32) * scale
    x2 = jax.random.uniform(k_x2, (B2,), dtype=jnp.float32)
    out2 = jax.block_until_ready(gaussian_fourier_projection(x2, W2))
    ref2 = _reference(x2, W2)
    assert out2.shape == (B2, embed_dim2)
    assert jnp.allclose(out2, ref2, atol=1e-4), "mismatch vs reference (large)"

    print("KERNEL_OK")
</pallas_src>

<mosaic_0001>
module attributes {stable_mosaic.version = 11 : i64} {
  func.func @_gfp_kernel_transposed(%arg0: i32, %arg1: memref<1x128xf32, #tpu.memory_space<vmem>>, %arg2: memref<16x1xf32, #tpu.memory_space<vmem>>, %arg3: memref<32x128xf32, #tpu.memory_space<vmem>>) attributes {dimension_semantics = [#tpu.dimension_semantics<parallel>], iteration_bounds = array<i64: 1>, scalar_prefetch = 0 : i64, scratch_operands = 0 : i64, tpu.core_type = #tpu.core_type<tc>, window_params = [{transform_indices = @transform_0, window_bounds = array<i64: 1, 128>}, {pipeline_mode = #tpu.pipeline_mode<synchronous>, transform_indices = @transform_1, window_bounds = array<i64: 16, 1>}, {transform_indices = @transform_2, window_bounds = array<i64: 32, 128>}]} {
    %c0 = arith.constant 0 : index
    %c0_0 = arith.constant 0 : index
    %0 = vector.load %arg2[%c0, %c0_0] : memref<16x1xf32, #tpu.memory_space<vmem>>, vector<16x1xf32>
    %c0_1 = arith.constant 0 : index
    %c0_2 = arith.constant 0 : index
    %1 = vector.load %arg1[%c0_1, %c0_2] : memref<1x128xf32, #tpu.memory_space<vmem>>, vector<1x128xf32>
    %2 = vector.broadcast %0 : vector<16x1xf32> to vector<16x128xf32>
    %3 = vector.broadcast %1 : vector<1x128xf32> to vector<16x128xf32>
    %4 = arith.mulf %2, %3 : vector<16x128xf32>
    %cst = arith.constant 2.000000e+00 : f32
    %5 = vector.broadcast %cst : f32 to vector<16x128xf32>
    %6 = arith.mulf %4, %5 : vector<16x128xf32>
    %cst_3 = arith.constant 3.14159274 : f32
    %7 = vector.broadcast %cst_3 : f32 to vector<16x128xf32>
    %8 = arith.mulf %6, %7 : vector<16x128xf32>
    %9 = math.sin %8 : vector<16x128xf32>
    %c0_4 = arith.constant 0 : index
    %c0_5 = arith.constant 0 : index
    %10 = vector.load %arg3[%c0_4, %c0_5] : memref<32x128xf32, #tpu.memory_space<vmem>>, vector<16x128xf32>
    tpu.vector_store %arg3[%c0_4, %c0_5], %9 {strides = array<i32>} : memref<32x128xf32, #tpu.memory_space<vmem>>, vector<16x128xf32>,
    %11 = math.cos %8 : vector<16x128xf32>
    %c16 = arith.constant 16 : index
    %c0_6 = arith.constant 0 : index
    %12 = vector.load %arg3[%c16, %c0_6] : memref<32x128xf32, #tpu.memory_space<vmem>>, vector<16x128xf32>
    tpu.vector_store %arg3[%c16, %c0_6], %11 {strides = array<i32>} : memref<32x128xf32, #tpu.memory_space<vmem>>, vector<16x128xf32>,
    return
  }
  func.func @transform_0(%arg0: i32) -> (i32, i32) {
    %c0_i32 = arith.constant 0 : i32
    %c0_i32_0 = arith.constant 0 : i32
    return %c0_i32, %arg0 : i32, i32
  }
  func.func @transform_1(%arg0: i32) -> (i32, i32) {
    %c0_i32 = arith.constant 0 : i32
    %c0_i32_0 = arith.constant 0 : i32
    %c0_i32_1 = arith.constant 0 : i32
    return %c0_i32, %c0_i32_0 : i32, i32
  }
  func.func @transform_2(%arg0: i32) -> (i32, i32) {
    %c0_i32 = arith.constant 0 : i32
    %c0_i32_0 = arith.constant 0 : i32
    return %c0_i32, %arg0 : i32, i32
  }
}

</mosaic_0001>

<bundles_post_ra>
// kernel: tpu_custom_call.1
= control target key start
LH: loop header
LB: loop body
LE: loop exit
PB: predicated region body
PF: predicated region fallthrough
CT: control target
= control target key end

     0   :  { %v539_v1 = vmov 0   ;;  %s645_s0 = inlined_call_operand.vmem [shape: f32[1,128], index: 0, kind: input, shape index: {}]   ;;  %s646_s1 = inlined_call_operand.vmem [shape: f32[16,1], index: 1, kind: input, shape index: {}]   ;;  %s647_s2 = inlined_call_operand.hbm [shape: f32[32,128], index: 2, kind: output, shape index: {}]  }
   0x1   :  { %v12_v0 = vld [vmem:[%s646_s1] sm:$0xff]  ;;  %506 = vset.pattern.permute.xlu0 %v539_v1  ;;  %v13_v2 = vld [vmem:[%s646_s1 + $0x8] sm:$0xff] }
   0x2   :  { %17 = vperm.xlu0 %506, %v12_v0  }
   0x3   :  { %7 = vsyncpa [#allocation3], 0  ;;  %v471_v3 = vld [vmem:[%s645_s0] ss:$0 sm:$0xff]  ;;  %v540_v28 = vmov 683565275  }
   0x4   :  { %v541_v32 = vmov 2475754826   ;;  %v542_v34 = vmov 2131351028   ;;  %v543_v36 = vmov 2102212464  }
   0x5   :  { %v544_v38 = vmov 920167782   ;;  %v545_v45 = vmov 1326507024   ;;  %s546_s0 = smov [#allocation2]  }
   0x6   :  { %22 = vperm.xlu0 %506, %v13_v2   ;;  %s460_s1 = sshll.u32 %s546_s0, 4  ;;  %s461_s1 = int_to_ptr.vmem [resolvable:$true] %s460_s1 }
   0x7   :  { %s515_s15 = scalar_lea.vmem %s461_s1, 512  ;;  %p520_p1 = scmp.lt.s32.totalorder %s461_s1, %s461_s1 }
   0x8   :  { %p516_p0 = scmp.ne.s32.totalorder %s461_s1, %s515_s15  ;;  %p521_p2 = scmp.lt.s32.totalorder %s515_s15, %s515_s15 }
   0xa   :  { %p522_p3 = por %p521_p2, %p520_p1 }
   0xc   :  { %p523_p4 = pnand %p522_p3, %p516_p0 }
  0x81   :  { %v18_v4 = vpop.permute.xlu0 %17 }
  0x82   :  { %v31_v5 = vmul.f32 %v471_v3, %v18_v4 }
  0x84   :  { %v33_v6 = vmul.f32 2.0, %v31_v5 }
  0x85   :  { %v23_v7 = vpop.permute.xlu0 %22 }
  0x86   :  { %v573_v8 = vmul.f32 3.1415927, %v33_v6  ;;  %v32_v9 = vmul.f32 %v471_v3, %v23_v7 }
  0x88   :  { %v37_v10 = vand.u32 2147483647, %v573_v8  ;;  %v40_v11 = vand.u32 2139095040, %v573_v8  ;;  %v34_v12 = vmul.f32 2.0, %v32_v9  ;;  %vm39_vm14 = vcmp.lt.s32.totalorder %v573_v8, 0 }
  0x8a   :  { %v41_v13 = vshrl.u32 %v40_v11, 23  ;;  %v44_v14 = vand.u32 8388607, %v37_v10  ;;  %v579_v15 = vmul.f32 3.1415927, %v34_v12 }
  0x8b   :  { %vm38_vm15 = vcmp.le.f32.partialorder %v37_v10, 0.7853982 }
  0x8c   :  { %v472_v16 = vadd.s32 4294967169, %v41_v13  ;;  %v144_v17 = vand.u32 2139095040, %v579_v15  ;;  %v45_v19 = vor.u32 8388608, %v44_v14  ;;  %v141_v21 = vand.u32 2147483647, %v579_v15 }
  0x8e   :  { %v47_v18 = vadd.s32 1, %v472_v16  ;;  %v145_v20 = vshrl.u32 %v144_v17, 23  ;;  %v583_v26 = vshll.u32 %v45_v19, 8  ;;  %v148_v30 = vand.u32 8388607, %v141_v21 }
  0x90   :  { %vm48_vm0 = vcmp.gt.s32.totalorder %v47_v18, 0  ;;  %v476_v23 = vadd.s32 4294967169, %v145_v20  ;;  %v149_v60 = vor.u32 8388608, %v148_v30 }
  0x91   :  { %v49_v22 = vsel %vm48_vm0, %v47_v18, 0  ;;  %vm143_vm0 = vcmp.lt.s32.totalorder %v579_v15, 0 }
  0x92   :  { %v50_v24 = vshrl.u32 %v49_v22, 5  ;;  %v51_v25 = vand.u32 31, %v49_v22  ;;  %v151_v31 = vadd.s32 1, %v476_v23  ;;  %v189_v11 = vshll.u32 %v149_v60, 8 }
  0x94   :  { %v52_v27 = vsub.s32 32, %v51_v25  ;;  %v54_v29 = vshll.u32 %v540_v28, %v51_v25  ;;  %v57_v33 = vshll.u32 %v541_v32, %v51_v25  ;;  %v60_v35 = vshll.u32 %v542_v34, %v51_v25 }
  0x95   :  { %v63_v37 = vshll.u32 %v543_v36, %v51_v25  ;;  %v66_v39 = vshll.u32 %v544_v38, %v51_v25  ;;  %vm69_vm1 = vcmp.lt.s32.totalorder %v50_v24, 1  ;;  %vm71_vm2 = vcmp.lt.s32.totalorder %v50_v24, 3 }
  0x96   :  { %v55_v40 = vshrl.u32 %v541_v32, %v52_v27  ;;  %v58_v41 = vshrl.u32 %v542_v34, %v52_v27  ;;  %v61_v42 = vshrl.u32 %v543_v36, %v52_v27  ;;  %v53_v43 = vshrl.u32 %v540_v28, %v52_v27 }
  0x97   :  { %v64_v44 = vshrl.u32 %v544_v38, %v52_v27  ;;  %v67_v46 = vshrl.u32 %v545_v45, %v52_v27  ;;  %vm152_vm3 = vcmp.gt.s32.totalorder %v151_v31, 0  ;;  %vm72_vm4 = vcmp.lt.s32.totalorder %v50_v24, 4 }
  0x98   :  { %v56_v47 = vor.u32 %v55_v40, %v54_v29  ;;  %v59_v48 = vor.u32 %v58_v41, %v57_v33  ;;  %v62_v49 = vor.u32 %v61_v42, %v60_v35  ;;  %v153_v52 = vsel %vm152_vm3, %v151_v31, 0 }
  0x99   :  { %v65_v50 = vor.u32 %v64_v44, %v63_v37  ;;  %v68_v51 = vor.u32 %v67_v46, %v66_v39  ;;  %vm70_vm5 = vcmp.lt.s32.totalorder %v50_v24, 2  ;;  %v155_v63 = vand.u32 31, %v153_v52 }
  0x9a   :  { %v73_v53 = vsel %vm69_vm1, %v53_v43, %v56_v47  ;;  %v74_v54 = vsel %vm72_vm4, %v62_v49, 2102212464  ;;  %v77_v55 = vsel %vm69_vm1, %v56_v47, %v59_v48  ;;  %v81_v56 = vsel %vm69_vm1, %v59_v48, %v62_v49 }
  0x9b   :  { %v75_v57 = vsel %vm71_vm2, %v59_v48, %v74_v54  ;;  %v78_v58 = vsel %vm72_vm4, %v65_v50, 920167782  ;;  %v82_v59 = vsel %vm72_vm4, %v68_v51, 1326507024  ;;  %v154_v7 = vshrl.u32 %v153_v52, 5 }
  0x9c   :  { %v79_v61 = vsel %vm71_vm2, %v62_v49, %v78_v58  ;;  %v83_v62 = vsel %vm71_vm2, %v65_v50, %v82_v59  ;;  %v76_v0 = vsel %vm70_vm5, %v73_v53, %v75_v57  ;;  %v156_v9 = vsub.s32 32, %v155_v63 }
  0x9d   :  { %v80_v1 = vsel %vm70_vm5, %v77_v55, %v79_v61  ;;  %v84_v2 = vsel %vm70_vm5, %v81_v56, %v83_v62  ;;  %v92_v12 = vmul.u32 %v583_v26, %v76_v0  ;;  %v158_v13 = vshll.u32 %v540_v28, %v155_v63 }
  0x9e   :  { %v596_v3 = vmul.u32.u64.low %v583_v26, %v84_v2  ;;  %v597_v4 = vmul.u32.u64.high %v583_v26, %v84_v2, %v596_v3  ;;  %v600_v5 = vmul.u32.u64.low %v583_v26, %v80_v1  ;;  %v601_v6 = vmul.u32.u64.high %v583_v26, %v80_v1, %v600_v5 }
  0x9f   :  { %v161_v14 = vshll.u32 %v541_v32, %v155_v63  ;;  %v164_v16 = vshll.u32 %v542_v34, %v155_v63  ;;  %v159_v17 = vshrl.u32 %v541_v32, %v156_v9  ;;  %v162_v18 = vshrl.u32 %v542_v34, %v156_v9 }
  0xa0   :  { %v165_v19 = vshrl.u32 %v543_v36, %v156_v9  ;;  %v167_v20 = vshll.u32 %v543_v36, %v155_v63  ;;  %vm94_vm6 = vc.u32 %v597_v4, %v600_v5  ;;  %v95_v22 = vadd.s32 1, %v601_v6 }
  0xa1   :  { %v168_v23 = vshrl.u32 %v544_v38, %v156_v9  ;;  %v170_v24 = vshll.u32 %v544_v38, %v155_v63  ;;  %v160_v25 = vor.u32 %v159_v17, %v158_v13  ;;  %v163_v27 = vor.u32 %v162_v18, %v161_v14 }
  0xa2   :  { %v166_v29 = vor.u32 %v165_v19, %v164_v16  ;;  %v171_v30 = vshrl.u32 %v545_v45, %v156_v9  ;;  %v96_v26 = vsel %vm94_vm6, %v95_v22, %v601_v6  ;;  %vm173_vm7 = vcmp.lt.s32.totalorder %v154_v7, 1 }
  0xa3   :  { %v169_v31 = vor.u32 %v168_v23, %v167_v20  ;;  %vm176_vm8 = vcmp.lt.s32.totalorder %v154_v7, 4  ;;  %v97_v32 = vadd.s32 %v96_v26, %v92_v12  ;;  %vm175_vm9 = vcmp.lt.s32.totalorder %v154_v7, 3 }
  0xa4   :  { %v172_v33 = vor.u32 %v171_v30, %v170_v24  ;;  %v178_v34 = vsel %vm176_vm8, %v166_v29, 2102212464  ;;  %v157_v35 = vshrl.u32 %v540_v28, %v156_v9  ;;  %v181_v36 = vsel %vm173_vm7, %v160_v25, %v163_v27 }
  0xa5   :  { %v182_v37 = vsel %vm176_vm8, %v169_v31, 920167782  ;;  %v185_v39 = vsel %vm173_vm7, %v163_v27, %v166_v29  ;;  %v98_v40 = vadd.s32 536870912, %v97_v32  ;;  %vm174_vm10 = vcmp.lt.s32.totalorder %v154_v7, 2 }
  0xa6   :  { %v183_v38 = vsel %vm175_vm9, %v166_v29, %v182_v37  ;;  %v186_v41 = vsel %vm176_vm8, %v172_v33, 1326507024  ;;  %v177_v42 = vsel %vm173_vm7, %v157_v35, %v160_v25  ;;  %v179_v43 = vsel %vm175_vm9, %v163_v27, %v178_v34 }
  0xa7   :  { %v184_v44 = vsel %vm174_vm10, %v181_v36, %v183_v38  ;;  %v187_v45 = vsel %vm175_vm9, %v169_v31, %v186_v41  ;;  %v99_v46 = vshrl.u32 %v98_v40, 30  ;;  %v180_v52 = vsel %vm174_vm10, %v177_v42, %v179_v43 }
  0xa8   :  { %v188_v47 = vsel %vm174_vm10, %v185_v39, %v187_v45  ;;  %v611_v48 = vmul.u32.u64.low %v189_v11, %v184_v44  ;;  %v612_v49 = vmul.u32.u64.high %v189_v11, %v184_v44, %v611_v48  ;;  %v196_v55 = vmul.u32 %v189_v11, %v180_v52 }
  0xa9   :  { %v614_v50 = vmul.u32.u64.low %v189_v11, %v188_v47  ;;  %v615_v51 = vmul.u32.u64.high %v189_v11, %v188_v47, %v614_v50  ;;  %v100_v28 = vshll.u32 %v99_v46, 30  ;;  %v93_v3 = vadd.s32 %v600_v5, %v597_v4 }
  0xaa   :  { %v199_v54 = vadd.s32 1, %v612_v49  ;;  %v123_v25 = vsub.s32 4, %v99_v46  ;;  %vm142_vm1 = vcmp.le.f32.partialorder %v141_v21, 0.7853982  ;;  %vm129_vm8 = vweird.f32 %v573_v8 }
  0xab   :  { %v101_v53 = vsub.s32 %v97_v32, %v100_v28  ;;  %vm198_vm11 = vc.u32 %v615_v51, %v611_v48  ;;  %v197_v4 = vadd.s32 %v611_v48, %v615_v51 }
  0xac   :  { %v200_v57 = vsel %vm198_vm11, %v199_v54, %v612_v49  ;;  %v124_v34 = vsel %vm39_vm14, %v123_v25, %v99_v46 }
  0xad   :  { %v103_v56 = vsub.s32 0, %v101_v53  ;;  %v201_v58 = vadd.s32 %v200_v57, %v196_v55  ;;  %v126_v39 = vsel %vm38_vm15, 0, %v124_v34 }
  0xae   :  { %v130_v42 = vadd.s32 3, %v126_v39  ;;  %v340_v45 = vand.u32 3, %v126_v39 }
  0xaf   :  { %v473_v59 = vmin.u32 %v103_v56, %v101_v53  ;;  %v202_v60 = vadd.s32 536870912, %v201_v58 }
  0xb0   :  { %v131_v48 = vand.u32 3, %v130_v42  ;;  %vm345_vm2 = vcmp.eq.s32.totalorder %v340_v45, 2  ;;  %vm342_vm5 = vcmp.eq.s32.totalorder %v340_v45, 0  ;;  %vm341_vm7 = vcmp.lt.s32.totalorder %v340_v45, 2 }
  0xb1   :  { %v105_v61 = vclz %v473_v59  ;;  %v203_v62 = vshrl.u32 %v202_v60, 30 }
  0xb2   :  { %vm136_vm3 = vcmp.eq.s32.totalorder %v131_v48, 2  ;;  %vm133_vm4 = vcmp.eq.s32.totalorder %v131_v48, 0  ;;  %vm132_vm6 = vcmp.lt.s32.totalorder %v131_v48, 2 }
  0xb3   :  { %v474_v63 = vadd.s32 4294967294, %v105_v61  ;;  %v204_v0 = vshll.u32 %v203_v62, 30  ;;  %v227_v44 = vsub.s32 4, %v203_v62 }
  0xb5   :  { %vm475_vm12 = vcmp.lt.s32.totalorder %v474_v63, 0  ;;  %v205_v2 = vsub.s32 %v201_v58, %v204_v0  ;;  %v228_v46 = vsel %vm143_vm0, %v227_v44, %v203_v62 }
  0xb6   :  { %v108_v1 = vsel %vm475_vm12, 0, %v474_v63 }
  0xb7   :  { %v109_v6 = vsub.s32 32, %v108_v1  ;;  %v113_v7 = vsub.s32 4294967266, %v108_v1  ;;  %v207_v9 = vsub.s32 0, %v205_v2  ;;  %v110_v11 = vshll.u32 %v101_v53, %v108_v1 }
  0xb8   :  { %v230_v53 = vsel %vm142_vm1, 0, %v228_v46 }
  0xb9   :  { %v111_v12 = vshrl.u32 %v93_v3, %v109_v6  ;;  %v114_v13 = vadd.s32 127, %v113_v7  ;;  %v477_v14 = vmin.u32 %v207_v9, %v205_v2  ;;  %v234_v59 = vadd.s32 3, %v230_v53 }
  0xba   :  { %v443_v63 = vand.u32 3, %v230_v53 }
  0xbb   :  { %v112_v16 = vor.u32 %v111_v12, %v110_v11  ;;  %v115_v17 = vshll.u32 %v114_v13, 23  ;;  %v209_v18 = vclz %v477_v14  ;;  %v235_v62 = vand.u32 3, %v234_v59 }
  0xbc   :  { %vm448_vm10 = vcmp.eq.s32.totalorder %v443_v63, 2  ;;  %vm445_vm12 = vcmp.eq.s32.totalorder %v443_v63, 0 }
  0xbd   :  { %v116_v19 = vor.u32 4788187, %v115_v17  ;;  %v478_v20 = vadd.s32 4294967294, %v209_v18  ;;  %v119_v23 = vcvt.s32.f32 %v112_v16  ;;  %vm240_vm9 = vcmp.eq.s32.totalorder %v235_v62, 2 }
  0xbe   :  { %vm237_vm11 = vcmp.eq.s32.totalorder %v235_v62, 0 }
  0xbf   :  { %v117_v22 = vand.u32 2147483647, %v116_v19  ;;  %vm479_vm13 = vcmp.lt.s32.totalorder %v478_v20, 0 }
  0xc0   :  { %v212_v27 = vsel %vm479_vm13, 0, %v478_v20  ;;  %vm236_vm13 = vcmp.lt.s32.totalorder %v235_v62, 2 }
  0xc1   :  { %v120_v24 = vmul.f32 %v119_v23, %v117_v22  ;;  %v213_v5 = vsub.s32 32, %v212_v27  ;;  %v217_v29 = vsub.s32 4294967266, %v212_v27  ;;  %v214_v26 = vshll.u32 %v205_v2, %v212_v27 }
  0xc3   :  { %v121_v30 = vxor.u32 2147483648, %v120_v24  ;;  %v215_v31 = vshrl.u32 %v197_v4, %v213_v5  ;;  %v218_v32 = vadd.s32 127, %v217_v29 }
  0xc5   :  { %v122_v33 = vsel %vm39_vm14, %v121_v30, %v120_v24  ;;  %v216_v36 = vor.u32 %v215_v31, %v214_v26  ;;  %v219_v37 = vshll.u32 %v218_v32, 23  ;;  %vm444_vm14 = vcmp.lt.s32.totalorder %v443_v63, 2 }
  0xc6   :  { %v125_v35 = vsel %vm38_vm15, %v573_v8, %v122_v33  ;;  %vm233_vm15 = vweird.f32 %v579_v15 }
  0xc7   :  { %507 = vcosq.f32 %v125_v35  ;;  %v220_v40 = vor.u32 4788187, %v219_v37  ;;  %v223_v41 = vcvt.s32.f32 %v216_v36 }
  0xc8   :  { %509 = vsinq.f32 %v125_v35 }
  0xc9   :  { %v221_v38 = vand.u32 2147483647, %v220_v40 }
  0xcb   :  { %v224_v43 = vmul.f32 %v223_v41, %v221_v38 }
  0xcd   :  { %v225_v47 = vxor.u32 2147483648, %v224_v43 }
  0xcf   :  { %v226_v10 = vsel %vm143_vm0, %v225_v47, %v224_v43 }
  0xd0   :  { %v229_v50 = vsel %vm142_vm1, %v579_v15, %v226_v10 }
  0xd1   :  { %v508_v49 = vpop.eup %507  ;;  %511 = vcosq.f32 %v229_v50 }
  0xd2   :  { %v510_v51 = vpop.eup %509  ;;  %v137_v28 = vxor.u32 2147483648, %v508_v49  ;;  %513 = vsinq.f32 %v229_v50 }
  0xd3   :  { %v134_v52 = vxor.u32 2147483648, %v510_v51 }
  0xd4   :  { %v138_v54 = vsel %vm136_vm3, %v137_v28, %v510_v51  ;;  %v347_v55 = vsel %vm345_vm2, %v137_v28, %v510_v51 }
  0xd5   :  { %v135_v56 = vsel %vm133_vm4, %v508_v49, %v134_v52  ;;  %v344_v21 = vsel %vm342_vm5, %v508_v49, %v134_v52 }
  0xd6   :  { %v139_v57 = vsel %vm132_vm6, %v135_v56, %v138_v54  ;;  %v348_v58 = vsel %vm341_vm7, %v344_v21, %v347_v55 }
  0xd7   :  { %v140_v60 = vsel %vm129_vm8, nan, %v139_v57  ;;  %v349_v61 = vsel %vm129_vm8, nan, %v348_v58 }
  0xd8   :  { %245 = vst [vmem:[#allocation2] sm:$0xff] %v140_v60  ;;  %453 = vst [vmem:[#allocation2 + $0x10] sm:$0xff] %v349_v61 }
  0xdb   :  { %v512_v0 = vpop.eup %511 }
  0xdc   :  { %v514_v1 = vpop.eup %513  ;;  %v241_v2 = vxor.u32 2147483648, %v512_v0 }
  0xdd   :  { %v238_v3 = vxor.u32 2147483648, %v514_v1 }
  0xde   :  { %v242_v6 = vsel %vm240_vm9, %v241_v2, %v514_v1  ;;  %v450_v8 = vsel %vm448_vm10, %v241_v2, %v514_v1 }
  0xdf   :  { %v239_v7 = vsel %vm237_vm11, %v512_v0, %v238_v3  ;;  %v447_v9 = vsel %vm445_vm12, %v512_v0, %v238_v3 }
  0xe0   :  { %v243_v11 = vsel %vm236_vm13, %v239_v7, %v242_v6  ;;  %v451_v12 = vsel %vm444_vm14, %v447_v9, %v450_v8 }
  0xe1   :  { %v244_v13 = vsel %vm233_vm15, nan, %v243_v11  ;;  %v452_v14 = vsel %vm233_vm15, nan, %v451_v12 }
  0xe2   :  { %246 = vst [vmem:[#allocation2 + $0x8] sm:$0xff] %v244_v13  ;;  %454 = vst [vmem:[#allocation2 + $0x18] sm:$0xff] %v452_v14 }
  0xe3   :  { %526 = shalt.err (!%p523_p4)
}
  0xe4   :  { %s527_s18 = scalar_lea.hbm %s647_s2, 512 }
  0xe5   :  { %p528_p5 = scmp.ne.s32.totalorder %s647_s2, %s527_s18  ;;  %p531_p6 = scmp.lt.u32.totalorder %s527_s18, %s647_s2 }
  0xe7   :  { %p533_p7 = pnand %p531_p6, %p528_p5 }
  0xe9   :  { %536 = shalt.err (!%p533_p7)
}
  0xea   :  { %s547_s23 = smov 128   ;;  %s548_s24 = smov 8  }
  0xeb   :  { %466 = dma.vmem_to_hbm [thread:$0]  %s461_s1, 512, %s647_s2, [#allocation3], %s547_s23, %s547_s23, %s548_s24  }
  0xec   :  { %537 = dma.done.wait [#allocation3], 512  }
  0xed   :  { %538 = vsyncadd [#allocation3], 4294966784 }
  0xee   :  { %470 = vsyncpa [#allocation3], 1 }

</bundles_post_ra>
